<compile_context>
chip_gen: v7x
topology: tpu7x:2x2x1
jax: 0.10.0
libtpu: 0.0.40
codegen_flags: <defaults>
</compile_context>

<pallas_src>
import math

import jax
import jax.numpy as jnp
from jax.experimental import pallas as pl
from jax.experimental.pallas import tpu as pltpu


def _eca_kernel(w_ref, x_ref, o_ref, ppad_ref):
    """w_ref: (k,) f32 conv taps in SMEM.
    x_ref / o_ref: (Bt, C, L) blocks.  ppad_ref: (Bt, C + 2*pad) f32 VMEM scratch."""
    Bt, C, L = x_ref.shape
    k = w_ref.shape[0]
    pad = (k - 1) // 2

    x = x_ref[...]                                            # native dtype, (Bt, C, L)

    # Pooled stats, accumulated in f32 without materialising an f32 copy of the block.
    avg = jnp.sum(x, axis=-1, dtype=jnp.float32) * (1.0 / L)  # (Bt, C)
    mx = jnp.max(x, axis=-1).astype(jnp.float32)              # (Bt, C)
    pooled = avg + mx                                         # (Bt, C) f32

    # Channel conv as a k-tap slide over a zero-padded copy of `pooled` (exact f32 VPU
    # math, no O(C^2) weight, no MXU):  y[b, c] = sum_j w[j] * pooled[b, c + j - pad].
    ppad_ref[...] = jnp.zeros_like(ppad_ref)
    ppad_ref[:, pad:pad + C] = pooled
    y = jnp.zeros((Bt, C), jnp.float32)
    for j in range(k):                          # k is tiny (<= ~9) and static: unrolled
        y = y + w_ref[j] * ppad_ref[:, j:j + C]

    # Scale + multiply in x's native dtype (f32 inputs stay exact f32 end to end; bf16
    # inputs avoid a full-block f32 temp -- on v5e, which lacks a bf16 VALU, the compiler
    # inserts converts, which is still cheaper than holding an f32 copy of the block).
    scale = jax.nn.sigmoid(y).astype(x.dtype)                 # (Bt, C)
    o_ref[...] = x * scale[:, :, None]                        # broadcast over L


def eca_combined_pallas(x, conv_w, *, target_block_bytes=2 << 20):
    """x: (B, C, L).  conv_w: (k,) taps of Conv1d(1, 1, k, bias=False)."""
    B, C, L = x.shape
    k = int(conv_w.shape[0])
    pad = (k - 1) // 2
    itemsize = int(jnp.dtype(x.dtype).itemsize)

    # --- Block sizing ---------------------------------------------------------------
    # ~2 MiB of x per grid step: >= 8 steps once the tensor is >= ~16 MiB (pipeline in
    # steady state, first load / last store amortised), while 2 (in) + 2 (out) buffers
    # plus elementwise temps stay well under the 32 MiB VMEM limit on v5e/v6e/v7x.
    bytes_per_b = C * L * itemsize
    bt = int(max(1, min(B, target_block_bytes // max(bytes_per_b, 1))))
    # If everything would fit one block but the tensor is still >= 1 MiB, split into two
    # parallel grid steps so v7x's second TensorCore gets its own DMA stream.
    if bt == B and B >= 2 and B * bytes_per_b >= (1 << 20):
        bt = pl.cdiv(B, 2)
    nb = pl.cdiv(B, bt)
    # TODO(synk): B == 1 with very large C*L still runs as a single block on one core; an
    # L-tiled two-pass grid (stats pass + scale pass) would be needed to use both v7x TCs.

    x_spec_kwargs = {}
    if nb >= 8:
        # Deep grid: a third input buffer hides DMA-issue latency between tiny-compute steps.
        x_spec_kwargs["pipeline_mode"] = pl.Buffered(3)

    cost = pl.CostEstimate(
        flops=3 * B * C * L + 2 * B * C * k,
        transcendentals=B * C,
        bytes_accessed=2 * B * C * L * itemsize + 4 * k,
    )

    return pl.pallas_call(
        _eca_kernel,
        out_shape=jax.ShapeDtypeStruct((B, C, L), x.dtype),
        grid=(nb,),
        in_specs=[
            pl.BlockSpec(memory_space=pltpu.MemorySpace.SMEM),              # (k,) taps
            pl.BlockSpec((bt, C, L), lambda b: (b, 0, 0), **x_spec_kwargs),  # x block
        ],
        out_specs=pl.BlockSpec((bt, C, L), lambda b: (b, 0, 0)),
        scratch_shapes=[pltpu.VMEM((bt, C + 2 * pad), jnp.float32)],
        compiler_params=pltpu.CompilerParams(
            dimension_semantics=("parallel",),
            vmem_limit_bytes=32 * 1024 * 1024,
        ),
        cost_estimate=cost,
    )(conv_w.astype(jnp.float32), x)


def eca_combined_ref(x, conv_w):
    """Plain-JAX reference mirroring the PyTorch forward."""
    k = conv_w.shape[0]
    pad = (k - 1) // 2
    avg = jnp.mean(x, axis=-1, keepdims=True)                # (B, C, 1)
    mx = jnp.max(x, axis=-1, keepdims=True)                  # (B, C, 1)

    def conv1d_over_channels(p):                             # p: (B, C, 1)
        v = p[:, :, 0]                                       # (B, C)
        v = jnp.pad(v, ((0, 0), (pad, pad)))
        out = jnp.zeros_like(p[:, :, 0])
        for j in range(k):
            out = out + conv_w[j] * v[:, j: j + p.shape[1]]
        return out[:, :, None]                               # (B, C, 1)

    y = conv1d_over_channels(avg) + conv1d_over_channels(mx)
    return x * jax.nn.sigmoid(y)


if __name__ == "__main__":
    # Module config: channel=8, b=1, gamma=2 -> k = int(|(log2(8)+1)/2|) = 2 -> even -> 3
    channel, b_param, gamma = 8, 1, 2
    kernel_size = int(abs((math.log(channel, 2) + b_param) / gamma))
    kernel_size = kernel_size if kernel_size % 2 else kernel_size + 1

    key = jax.random.PRNGKey(0)
    kx, kw = jax.random.split(key)

    B, C, L = 2, channel, 16
    x = jax.random.normal(kx, (B, C, L), dtype=jnp.float32)

    # Deterministic Conv1d(1, 1, k, bias=False) weight (uniform like PyTorch's default).
    bound = 1.0 / math.sqrt(1 * kernel_size)
    conv_w = jax.random.uniform(kw, (kernel_size,), jnp.float32, -bound, bound)

    out = eca_combined_pallas(x, conv_w)
    jax.block_until_ready(out)

    ref = eca_combined_ref(x, conv_w)
    assert jnp.allclose(out, ref, atol=1e-5, rtol=1e-5), "mismatch vs reference"

    print("KERNEL_OK")
</pallas_src>

<mosaic_0001>
module attributes {stable_mosaic.version = 11 : i64} {
  func.func @_eca_kernel(%arg0: i32, %arg1: memref<3xf32, #tpu.memory_space<smem>>, %arg2: memref<2x8x16xf32, #tpu.memory_space<vmem>>, %arg3: memref<2x8x16xf32, #tpu.memory_space<vmem>>, %arg4: memref<2x10xf32, #tpu.memory_space<vmem>>) attributes {dimension_semantics = [#tpu.dimension_semantics<parallel>], iteration_bounds = array<i64: 1>, scalar_prefetch = 0 : i64, scratch_operands = 1 : i64, tpu.core_type = #tpu.core_type<tc>, window_params = [{transform_indices = @transform_0, window_bounds = array<i64: 3>}, {transform_indices = @transform_1, window_bounds = array<i64: 2, 8, 16>}, {transform_indices = @transform_2, window_bounds = array<i64: 2, 8, 16>}]} {
    %c0 = arith.constant 0 : index
    %c0_0 = arith.constant 0 : index
    %c0_1 = arith.constant 0 : index
    %0 = vector.load %arg2[%c0, %c0_0, %c0_1] : memref<2x8x16xf32, #tpu.memory_space<vmem>>, vector<2x8x16xf32>
    %cst = arith.constant dense<0.000000e+00> : vector<2x8xf32>
    %1 = vector.multi_reduction <add>, %0, %cst [2] : vector<2x8x16xf32> to vector<2x8xf32>
    %cst_2 = arith.constant 6.250000e-02 : f32
    %2 = vector.broadcast %cst_2 : f32 to vector<2x8xf32>
    %3 = arith.mulf %1, %2 : vector<2x8xf32>
    %cst_3 = arith.constant dense<0xFF800000> : vector<2x8xf32>
    %4 = vector.multi_reduction <maximumf>, %0, %cst_3 [2] : vector<2x8x16xf32> to vector<2x8xf32>
    %5 = arith.addf %3, %4 : vector<2x8xf32>
    %cst_4 = arith.constant 0.000000e+00 : f32
    %6 = vector.broadcast %cst_4 : f32 to vector<2x10xf32>
    %c0_5 = arith.constant 0 : index
    %c0_6 = arith.constant 0 : index
    %7 = vector.load %arg4[%c0_5, %c0_6] : memref<2x10xf32, #tpu.memory_space<vmem>>, vector<2x10xf32>
    tpu.vector_store %arg4[%c0_5, %c0_6], %6 {strides = array<i32>} : memref<2x10xf32, #tpu.memory_space<vmem>>, vector<2x10xf32>,
    %c0_7 = arith.constant 0 : index
    %c1 = arith.constant 1 : index
    %8 = vector.load %arg4[%c0_7, %c1] : memref<2x10xf32, #tpu.memory_space<vmem>>, vector<2x8xf32>
    tpu.vector_store %arg4[%c0_7, %c1], %5 {strides = array<i32>} : memref<2x10xf32, #tpu.memory_space<vmem>>, vector<2x8xf32>,
    %cst_8 = arith.constant 0.000000e+00 : f32
    %9 = vector.broadcast %cst_8 : f32 to vector<2x8xf32>
    %c0_9 = arith.constant 0 : index
    %10 = memref.load %arg1[%c0_9] : memref<3xf32, #tpu.memory_space<smem>>
    %c0_10 = arith.constant 0 : index
    %c0_11 = arith.constant 0 : index
    %11 = vector.load %arg4[%c0_10, %c0_11] : memref<2x10xf32, #tpu.memory_space<vmem>>, vector<2x8xf32>
    %12 = vector.broadcast %10 : f32 to vector<2x8xf32>
    %13 = arith.mulf %12, %11 : vector<2x8xf32>
    %14 = arith.addf %9, %13 : vector<2x8xf32>
    %c1_12 = arith.constant 1 : index
    %15 = memref.load %arg1[%c1_12] : memref<3xf32, #tpu.memory_space<smem>>
    %c0_13 = arith.constant 0 : index
    %c1_14 = arith.constant 1 : index
    %16 = vector.load %arg4[%c0_13, %c1_14] : memref<2x10xf32, #tpu.memory_space<vmem>>, vector<2x8xf32>
    %17 = vector.broadcast %15 : f32 to vector<2x8xf32>
    %18 = arith.mulf %17, %16 : vector<2x8xf32>
    %19 = arith.addf %14, %18 : vector<2x8xf32>
    %c2 = arith.constant 2 : index
    %20 = memref.load %arg1[%c2] : memref<3xf32, #tpu.memory_space<smem>>
    %c0_15 = arith.constant 0 : index
    %c2_16 = arith.constant 2 : index
    %21 = vector.load %arg4[%c0_15, %c2_16] : memref<2x10xf32, #tpu.memory_space<vmem>>, vector<2x8xf32>
    %22 = vector.broadcast %20 : f32 to vector<2x8xf32>
    %23 = arith.mulf %22, %21 : vector<2x8xf32>
    %24 = arith.addf %19, %23 : vector<2x8xf32>
    %25 = arith.negf %24 : vector<2x8xf32>
    %26 = math.exp %25 : vector<2x8xf32>
    %cst_17 = arith.constant 1.000000e+00 : f32
    %27 = vector.broadcast %cst_17 : f32 to vector<2x8xf32>
    %28 = arith.addf %27, %26 : vector<2x8xf32>
    %29 = arith.divf %27, %28 : vector<2x8xf32>
    %30 = vector.shape_cast %29 : vector<2x8xf32> to vector<2x8x1xf32>
    %31 = vector.broadcast %30 : vector<2x8x1xf32> to vector<2x8x16xf32>
    %32 = arith.mulf %0, %31 : vector<2x8x16xf32>
    %c0_18 = arith.constant 0 : index
    %c0_19 = arith.constant 0 : index
    %c0_20 = arith.constant 0 : index
    %33 = vector.load %arg3[%c0_18, %c0_19, %c0_20] : memref<2x8x16xf32, #tpu.memory_space<vmem>>, vector<2x8x16xf32>
    tpu.vector_store %arg3[%c0_18, %c0_19, %c0_20], %32 {strides = array<i32>} : memref<2x8x16xf32, #tpu.memory_space<vmem>>, vector<2x8x16xf32>,
    return
  }
  func.func @transform_0(%arg0: i32) -> i32 {
    %c0_i32 = arith.constant 0 : i32
    %c0_i32_0 = arith.constant 0 : i32
    return %c0_i32 : i32
  }
  func.func @transform_1(%arg0: i32) -> (i32, i32, i32) {
    %c0_i32 = arith.constant 0 : i32
    %c0_i32_0 = arith.constant 0 : i32
    %c0_i32_1 = arith.constant 0 : i32
    return %arg0, %c0_i32, %c0_i32_0 : i32, i32, i32
  }
  func.func @transform_2(%arg0: i32) -> (i32, i32, i32) {
    %c0_i32 = arith.constant 0 : i32
    %c0_i32_0 = arith.constant 0 : i32
    %c0_i32_1 = arith.constant 0 : i32
    return %arg0, %c0_i32, %c0_i32_0 : i32, i32, i32
  }
}

</mosaic_0001>

<bundles_post_ra>
// kernel: tpu_custom_call.1
= control target key start
LH: loop header
LB: loop body
LE: loop exit
PB: predicated region body
PF: predicated region fallthrough
CT: control target
= control target key end

     0   :  { %7 = vsyncpa [#allocation6], 0  ;;  %s295_s0 = inlined_call_operand.hbm [shape: f32[3], index: 0, kind: input, shape index: {}]   ;;  %s296_s1 = inlined_call_operand.hbm [shape: f32[2,8,16], index: 1, kind: input, shape index: {}]   ;;  %s297_s2 = inlined_call_operand.hbm [shape: f32[2,8,16], index: 2, kind: output, shape index: {}]  }
   0x1   :  { %8 = vsyncpa [#allocation4], 0 }
   0x2   :  { %9 = vsyncpa [#allocation5], 0  ;;  %s154_s11 = scalar_lea.hbm %s295_s0, 16 }
   0x3   :  { %p155_p0 = scmp.ne.s32.totalorder %s295_s0, %s154_s11  ;;  %p158_p1 = scmp.lt.u32.totalorder %s154_s11, %s295_s0 }
   0x5   :  { %p160_p2 = pnand %p158_p1, %p155_p0 }
   0x7   :  { %163 = shalt.err (!%p160_p2)
}
   0x8   :  { %s214_s16 = smov [#allocation3]   ;;  %s215_s19 = smov [#allocation7]  }
   0x9   :  { %17 = dma.hbm_to_smem %s295_s0, 16, %s214_s16, [#allocation6]  }
   0xa   :  { %s23_s20 = sshll.u32 %s215_s19, 4  ;;  %s164_s23 = scalar_lea.hbm %s296_s1, 256  ;;  %s24_s20 = int_to_ptr.vmem [resolvable:$true] %s23_s20 }
   0xb   :  { %p165_p3 = scmp.ne.s32.totalorder %s296_s1, %s164_s23  ;;  %p168_p4 = scmp.lt.u32.totalorder %s164_s23, %s296_s1 }
   0xd   :  { %p170_p5 = pnand %p168_p4, %p165_p3 }
   0xf   :  { %173 = shalt.err (!%p170_p5)
}
  0x10   :  { %s174_s28 = scalar_lea.vmem %s24_s20, 256  ;;  %p179_p7 = scmp.lt.s32.totalorder %s24_s20, %s24_s20 }
  0x11   :  { %p175_p6 = scmp.ne.s32.totalorder %s24_s20, %s174_s28  ;;  %p180_p8 = scmp.lt.s32.totalorder %s174_s28, %s174_s28 }
  0x13   :  { %p181_p9 = por %p180_p8, %p179_p7 }
  0x15   :  { %p182_p10 = pnand %p181_p9, %p175_p6 }
  0x17   :  { %185 = shalt.err (!%p182_p10)
}
  0x18   :  { %s216_s0 = smov 128   ;;  %s217_s29 = smov 8  }
  0x19   :  { %29 = dma.hbm_to_vmem [thread:$0]  %s296_s1, 256, %s24_s20, [#allocation4], %s216_s0, %s216_s0, %s217_s29  }
  0x1a   :  { %208 = dma.done.wait [#allocation6], 16  }
  0x1b   :  { %209 = vsyncadd [#allocation6], 4294967280 }
  0x1c   :  { %210 = dma.done.wait [#allocation4], 256  }
  0x1d   :  { %211 = vsyncadd [#allocation4], 4294967040 }
  0x1e   :  { %36 = sfence }
  0x1f   :  { %v264_v0 = vld [vmem:[#allocation7] sm:$0xff]  ;;  %vm39_vm0 = vcmask 130048   ;;  %v266_v1 = vld [vmem:[#allocation7 + $0x8] sm:$0xff]  ;;  %vm56_vm1 = vcmask 74752   ;;  %v218_v6 = vmov 0.0   ;;  %v60_v7 = vlaneseq  ;;  %s140_s1 = sld [smem:[#allocation3 + $0x2]] }
  0x20   :  { %v40_v2 = vsel %vm39_vm0, %v264_v0, 0.0  ;;  %v48_v3 = vsel %vm39_vm0, %v264_v0, -inf  ;;  %v43_v4 = vsel %vm39_vm0, %v266_v1, 0.0  ;;  %v51_v5 = vsel %vm39_vm0, %v266_v1, -inf  ;;  %57 = vst.msk [vmem:[#allocation2] sm:$0x3] %vm56_vm1, %v218_v6 }
  0x21   :  { %41 = vadd.xlane.f32.xlu0 %v40_v2  ;;  %49 = vmax.xlane.f32.xlu1 %v48_v3  ;;  %v61_v8 = vand.u32 127, %v60_v7  ;;  %v64_v13 = vshrl.u32 %v60_v7, 7  ;;  %vm71_vm2 = vcmask 1041409   ;;  %vm74_vm3 = vcmask 66568   ;;  %s139_s4 = sld [smem:[#allocation3 + $0x1]]  ;;  %s219_s5 = smov 126  }
  0x22   :  { %s220_s6 = smov 127   ;;  %s76_s7 = sld [smem:[#allocation3]] }
  0x23   :  { %v62_v12 = vadd.s32 4294967295, %v61_v8  ;;  %v105_v37 = vsub.s32 0, %v64_v13  ;;  %v112_v40 = vsub.s32 1, %v64_v13  ;;  %s221_s8 = smov [#allocation8]  }
  0x24   :  { %s126_s9 = sshll.u32 %s221_s8, 4  ;;  %s127_s9 = int_to_ptr.vmem [resolvable:$true] %s126_s9 }
  0x25   :  { %44 = vadd.xlane.f32.xlu0 %v43_v4  ;;  %52 = vmax.xlane.f32.xlu1 %v51_v5  ;;  %v65_v16 = vsub.s32 %v62_v12, %v64_v13  ;;  %v90_v23 = vstv %s140_s1  ;;  %s186_s10 = scalar_lea.vmem %s127_s9, 256  ;;  %p191_p12 = scmp.lt.s32.totalorder %s127_s9, %s127_s9 }
  0x26   :  { %p187_p11 = scmp.ne.s32.totalorder %s127_s9, %s186_s10  ;;  %p192_p13 = scmp.lt.s32.totalorder %s186_s10, %s186_s10 }
  0x27   :  { %v82_v24 = vstv %s139_s4 }
  0x28   :  { %v78_v28 = vstv %s76_s7  ;;  %p193_p0 = por %p192_p13, %p191_p12 }
  0x2a   :  { %p194_p1 = pnand %p193_p0, %p187_p11 }
  0xae   :  { %v42_v9 = vpop.xlane.xlu0 %41  ;;  %v50_v10 = vpop.xlane.xlu1 %49 }
  0xaf   :  { %v46_v11 = vmul.f32 0.0625, %v42_v9 }
  0xb1   :  { %v54_v17 = vadd.f32 %v50_v10, %v46_v11 }
  0xb2   :  { %v45_v14 = vpop.xlane.xlu0 %44  ;;  %v53_v15 = vpop.xlane.xlu1 %52 }
  0xb3   :  { %v47_v18 = vmul.f32 0.0625, %v45_v14  ;;  %v66_v20 = vrot.slane %v54_v17, %v65_v16 }
  0xb5   :  { %v55_v19 = vadd.f32 %v53_v15, %v47_v18 }
  0xb7   :  { %v70_v21 = vrot.slane %v55_v19, %v65_v16 }
  0xb9   :  { %v72_v22 = vsel %vm71_vm2, %v70_v21, %v66_v20 }
  0xba   :  { %75 = vst.msk [vmem:[#allocation2] sm:$0x3] %vm74_vm3, %v72_v22 }
  0xc1   :  { %v77_v25 = vld [vmem:[#allocation2] sm:$0x3] }
  0xc2   :  { %v91_v26 = vmul.f32 %v90_v23, %v77_v25  ;;  %v83_v27 = vmul.f32 %v82_v24, %v77_v25  ;;  %v79_v29 = vmul.f32 %v78_v28, %v77_v25 }
  0xc4   :  { %93 = vrot.lane.b32.xlu1 %v91_v26, %s219_s5  ;;  %85 = vrot.lane.b32.xlu0 %v83_v27, %s220_s6 }
 0x136   :  { %v86_v30 = vpop.permute.xlu0 %85  ;;  %v94_v32 = vpop.permute.xlu1 %93 }
 0x137   :  { %v88_v31 = vadd.f32 %v86_v30, %v79_v29 }
 0x139   :  { %v96_v33 = vadd.f32 %v94_v32, %v88_v31 }
 0x13b   :  { %v141_v34 = vmul.f32 -1.442695, %v96_v33 }
 0x13d   :  { %150 = vpow2.f32 %v141_v34 }
 0x147   :  { %v151_v35 = vpop.eup %150 }
 0x148   :  { %v100_v36 = vadd.f32 1.0, %v151_v35 }
 0x14a   :  { %152 = vrcp.f32 %v100_v36 }
 0x154   :  { %v153_v38 = vpop.eup %152 }
 0x155   :  { %v106_v39 = vrot.slane %v153_v38, %v105_v37  ;;  %v113_v41 = vrot.slane %v153_v38, %v112_v40 }
 0x157   :  { %108 = vbcast.lane.b32.xlu1 %v106_v39, 256 }
 0x15b   :  { %115 = vbcast.lane.b32.xlu1 %v113_v41, 256 }
 0x1c9   :  { %v109_v42 = vpop.permute.xlu1 %108 }
 0x1ca   :  { %v117_v43 = vmul.f32 %v109_v42, %v264_v0 }
 0x1cc   :  { %119 = vst.msk [vmem:[#allocation8] sm:$0xff] %vm39_vm0, %v117_v43 }
 0x1cd   :  { %v116_v44 = vpop.permute.xlu1 %115 }
 0x1ce   :  { %v118_v45 = vmul.f32 %v116_v44, %v266_v1 }
 0x1d0   :  { %120 = vst.msk [vmem:[#allocation8 + $0x8] sm:$0xff] %vm39_vm0, %v118_v45 }
 0x1d1   :  { %197 = shalt.err (!%p194_p1)
}
 0x1d2   :  { %s198_s13 = scalar_lea.hbm %s297_s2, 256 }
 0x1d3   :  { %p199_p2 = scmp.ne.s32.totalorder %s297_s2, %s198_s13  ;;  %p202_p3 = scmp.lt.u32.totalorder %s198_s13, %s297_s2 }
 0x1d5   :  { %p204_p4 = pnand %p202_p3, %p199_p2 }
 0x1d7   :  { %207 = shalt.err (!%p204_p4)
}
 0x1d8   :  { %132 = dma.vmem_to_hbm [thread:$0]  %s127_s9, 256, %s297_s2, [#allocation5], %s216_s0, %s216_s0, %s217_s29  }
 0x1d9   :  { %212 = dma.done.wait [#allocation5], 256  }
 0x1da   :  { %213 = vsyncadd [#allocation5], 4294967040 }
 0x1db   :  { %136 = vsyncpa [#allocation4], 1 }
 0x1dc   :  { %137 = vsyncpa [#allocation5], 1 }
 0x1dd   :  { %138 = vsyncpa [#allocation6], 1 }

</bundles_post_ra>
